<compile_context>
chip_gen: v5e
topology: v5e:2x2
jax: 0.10.0
libtpu: 0.0.40
codegen_flags: <defaults>
</compile_context>

<pallas_src>
import math

import jax
import jax.numpy as jnp
from jax.experimental import pallas as pl
from jax.experimental.pallas import tpu as pltpu

_LANE = 128
_SUBLANE = 8
_TARGET_BLOCK_BYTES = 2 * 1024 * 1024  # ~2 MiB tiles: >= 85% of HBM roofline, safe on all gens.


def _cdiv(a: int, b: int) -> int:
    return -(-a // b)


def _round_up(a: int, b: int) -> int:
    return _cdiv(a, b) * b


def _fold_factor(batch: int, feat: int, pack: int) -> int:
    """Smallest r with feat % r == 0 and (batch * r) % pack == 0 (bounded search)."""
    base = pack // math.gcd(batch, pack)
    if base <= 1:
        return 1
    r, tries = base, 0
    while r <= feat and tries < 64:
        if feat % r == 0:
            return r
        r += base
        tries += 1
    return 1


def _drop_path_kernel(scale_ref, x_ref, o_ref):
    # scale_ref: (TB, 1) float32 per-row scale (0 or 1/keep_prob).
    # x_ref/o_ref: (TB, TN) tiles in the activation dtype.
    # HBM-bound broadcast-multiply; do the math in f32, cast once on store.
    o_ref[...] = (x_ref[...].astype(jnp.float32) * scale_ref[...]).astype(o_ref.dtype)


def drop_path(x, drop_prob: float = 0.0, training: bool = False, seed: int = 0,
              key=None, donate_x: bool = False):
    """Pallas implementation of torch `drop_path` for any >=1D input (batch first)."""
    if drop_prob == 0.0 or not training:
        return x

    keep_prob = 1.0 - float(drop_prob)
    orig_shape = x.shape
    B = orig_shape[0]
    N = math.prod(orig_shape[1:]) if len(orig_shape) > 1 else 1
    itemsize = jnp.dtype(x.dtype).itemsize

    # ---- per-sample mask / scale (matches torch: floor(keep_prob + U[0,1))) ----
    # TODO(synk): callers should thread a fresh `key`/`seed` per step & layer;
    # the default seed reuses the same drop pattern every call.
    if key is None:
        key = jax.random.PRNGKey(seed)
    u = jax.random.uniform(key, (B, 1), dtype=jnp.float32)
    scale = jnp.floor(keep_prob + u) * (1.0 / keep_prob)     # (B, 1) f32, 0 or 1/keep_prob

    # ---- dtype-aware packed sublane count (8 f32, 16 bf16, 32 int8/fp8) ----
    sublane_pack = _SUBLANE * max(1, 4 // itemsize)

    # ---- fold features into sublanes when the batch is small (free reshape) ----
    r = 1
    if B < sublane_pack and N > 1:
        r = _fold_factor(B, N, sublane_pack)
    rows = B * r
    feat = N // r

    x2d = x.reshape(rows, feat)
    scale_rows = jnp.repeat(scale, r, axis=0) if r > 1 else scale   # (rows, 1) f32

    # ---- tiling: full packed sublanes, lane-dense feature tiles of ~2 MiB ----
    TB = sublane_pack if rows >= sublane_pack else rows
    tb_phys = _round_up(TB, sublane_pack)                    # physical (sublane-padded) rows
    max_tn = max(_LANE, (_TARGET_BLOCK_BYTES // (tb_phys * itemsize)) // _LANE * _LANE)
    TN = min(max_tn, _round_up(feat, _LANE))

    # Small feature axis but large batch: grow TB (multiples of the packed count)
    # so blocks stay near the target size and per-step overhead is amortized.
    if TB * TN * itemsize < _TARGET_BLOCK_BYTES and rows > TB and TB == sublane_pack:
        mult = max(1, _TARGET_BLOCK_BYTES // (TN * itemsize * sublane_pack))
        TB = min(_round_up(rows, sublane_pack), mult * sublane_pack)

    # v7x: never leave the grid at a single step (2 TensorCores + pipelining).
    if _cdiv(rows, TB) == 1 and _cdiv(feat, TN) == 1:
        if feat > _LANE:
            TN = max(_LANE, _round_up(_cdiv(feat, 2), _LANE))
        elif rows > sublane_pack:
            TB = max(sublane_pack, _round_up(_cdiv(rows, 2), sublane_pack))

    grid = (_cdiv(rows, TB), _cdiv(feat, TN))

    extra = {}
    if donate_x:
        # Alias x2d -> output; only enable when the caller can donate x.
        extra["input_output_aliases"] = {1: 0}

    out2d = pl.pallas_call(
        _drop_path_kernel,
        out_shape=jax.ShapeDtypeStruct((rows, feat), x.dtype),
        grid=grid,
        in_specs=[
            pl.BlockSpec((TB, 1), lambda i, j: (i, 0)),      # per-row f32 scale
            pl.BlockSpec((TB, TN), lambda i, j: (i, j)),     # activation tile
        ],
        out_specs=pl.BlockSpec((TB, TN), lambda i, j: (i, j)),
        compiler_params=pltpu.CompilerParams(
            dimension_semantics=("parallel", "parallel"),
            vmem_limit_bytes=32 * 1024 * 1024,
        ),
        cost_estimate=pl.CostEstimate(
            flops=rows * feat,
            transcendentals=0,
            bytes_accessed=2 * rows * feat * itemsize + rows * 4,
        ),
        **extra,
    )(scale_rows, x2d)

    return out2d.reshape(orig_shape)


class DropPath:
    """Drop paths (Stochastic Depth) per sample (main path of residual blocks)."""

    def __init__(self, drop_prob=None):
        self.drop_prob = drop_prob if drop_prob is not None else 0.0
        self.training = True

    def __call__(self, x, seed: int = 0, key=None):
        # NOTE: vary `seed`/`key` per step/layer for fresh randomness.
        return drop_path(x, self.drop_prob, self.training, seed=seed, key=key)


if __name__ == "__main__":
    key = jax.random.PRNGKey(0)
    x = jax.random.normal(key, (2, 4, 16, 16), dtype=jnp.float32)  # NCHW

    module = DropPath(drop_prob=0.25)
    module.training = True
    out = jax.block_until_ready(module(x, seed=42))

    # Sanity check: each sample is either zeroed or scaled by 1/keep_prob.
    keep_prob = 1.0 - 0.25
    x_np = jax.device_get(x)
    out_np = jax.device_get(out)
    for b in range(x_np.shape[0]):
        is_zero = bool(jnp.allclose(out_np[b], 0.0))
        is_scaled = bool(jnp.allclose(out_np[b], x_np[b] / keep_prob, atol=1e-5))
        assert is_zero or is_scaled, "per-sample drop-path semantics violated"

    # Eval mode: identity.
    module_eval = DropPath(drop_prob=0.25)
    module_eval.training = False
    out_eval = jax.block_until_ready(module_eval(x))
    assert bool(jnp.allclose(out_eval, x))

    # drop_prob = 0 path: identity even in training mode.
    module_zero = DropPath(drop_prob=0.0)
    module_zero.training = True
    out_zero = jax.block_until_ready(module_zero(x))
    assert bool(jnp.allclose(out_zero, x))

    # bf16 path exercises the dtype-aware (16-row) sublane tiling + f32 scale math.
    xb = x.astype(jnp.bfloat16)
    outb = jax.block_until_ready(module(xb, seed=7))
    xb_np, outb_np = jax.device_get(xb), jax.device_get(outb)
    for b in range(xb_np.shape[0]):
        is_zero = bool(jnp.allclose(outb_np[b].astype(jnp.float32), 0.0))
        is_scaled = bool(jnp.allclose(outb_np[b].astype(jnp.float32),
                                      xb_np[b].astype(jnp.float32) / keep_prob,
                                      atol=2e-2, rtol=2e-2))
        assert is_zero or is_scaled, "bf16 drop-path semantics violated"

    print("KERNEL_OK")
</pallas_src>

<mosaic_0001>
module attributes {stable_mosaic.version = 11 : i64} {
  func.func @_drop_path_kernel(%arg0: i32, %arg1: i32, %arg2: memref<8x1xf32, #tpu.memory_space<vmem>>, %arg3: memref<8x128xf32, #tpu.memory_space<vmem>>, %arg4: memref<8x128xf32, #tpu.memory_space<vmem>>) attributes {dimension_semantics = [#tpu.dimension_semantics<parallel>, #tpu.dimension_semantics<parallel>], iteration_bounds = array<i64: 1, 2>, scalar_prefetch = 0 : i64, scratch_operands = 0 : i64, tpu.core_type = #tpu.core_type<tc>, window_params = [{transform_indices = @transform_0, window_bounds = array<i64: 8, 1>}, {transform_indices = @transform_1, window_bounds = array<i64: 8, 128>}, {transform_indices = @transform_2, window_bounds = array<i64: 8, 128>}]} {
    %c0 = arith.constant 0 : index
    %c0_0 = arith.constant 0 : index
    %0 = vector.load %arg3[%c0, %c0_0] : memref<8x128xf32, #tpu.memory_space<vmem>>, vector<8x128xf32>
    %c0_1 = arith.constant 0 : index
    %c0_2 = arith.constant 0 : index
    %1 = vector.load %arg2[%c0_1, %c0_2] : memref<8x1xf32, #tpu.memory_space<vmem>>, vector<8x1xf32>
    %2 = vector.broadcast %1 : vector<8x1xf32> to vector<8x128xf32>
    %3 = arith.mulf %0, %2 : vector<8x128xf32>
    %c0_3 = arith.constant 0 : index
    %c0_4 = arith.constant 0 : index
    %4 = vector.load %arg4[%c0_3, %c0_4] : memref<8x128xf32, #tpu.memory_space<vmem>>, vector<8x128xf32>
    tpu.vector_store %arg4[%c0_3, %c0_4], %3 {strides = array<i32>} : memref<8x128xf32, #tpu.memory_space<vmem>>, vector<8x128xf32>,
    return
  }
  func.func @transform_0(%arg0: i32, %arg1: i32) -> (i32, i32) {
    %c0_i32 = arith.constant 0 : i32
    %c0_i32_0 = arith.constant 0 : i32
    return %arg0, %c0_i32 : i32, i32
  }
  func.func @transform_1(%arg0: i32, %arg1: i32) -> (i32, i32) {
    %c0_i32 = arith.constant 0 : i32
    return %arg0, %arg1 : i32, i32
  }
  func.func @transform_2(%arg0: i32, %arg1: i32) -> (i32, i32) {
    %c0_i32 = arith.constant 0 : i32
    return %arg0, %arg1 : i32, i32
  }
}

</mosaic_0001>

<bundles_post_ra>
// kernel: tpu_custom_call.1
= control target key start
LH: loop header
LB: loop body
LE: loop exit
PB: predicated region body
PF: predicated region fallthrough
CT: control target
= control target key end

     0   :  { %7 = vsyncpa [#allocation3], 0  ;;  %s651_s0 = inlined_call_operand.vmem [shape: f32[8,1], index: 0, kind: input, shape index: {}]   ;;  %s652_s1 = inlined_call_operand.hbm [shape: f32[8,256], index: 1, kind: input, shape index: {}]   ;;  %s653_s2 = inlined_call_operand.hbm [shape: f32[8,256], index: 2, kind: output, shape index: {}]  }
   0x1   :  { %9 = vsyncpa [#allocation3 + $0x1], 0 }
   0x2   :  { %10 = vsyncpa [#allocation4], 0 }
   0x3   :  { %12 = vsyncpa [#allocation4 + $0x1], 0  ;;  %s528_s9 = smov 0   ;;  %s530_s10 = smov 0  }
   0x4   :  { %s532_s11 = smov 0   ;;  %s534_s12 = smov 0  }
   0x5   :  { %s536_s13 = smov 0   ;;  %s538_s14 = smov 0  }
   0x6 LB: > { %s320_s15 = sadd.s32 4294967295, %s510_s14   ;;  %s321_s16 = sadd.s32 4294967294, %s510_s14   ;;  %s510_s14 = sphi %s538_s14, %s18_s14   ;;  %s506_s13 = sphi %s536_s13, %s662_s13   ;;  %s502_s12 = sphi %s534_s12, %s661_s12   ;;  %s498_s11 = sphi %s532_s11, %s660_s11   ;;  %s494_s10 = sphi %s530_s10, %s659_s10   ;;  %s490_s9 = sphi %s528_s9, %s658_s9  }
   0x7   : > { %s27_s17 = sadd.s32 1, %s506_s13  ;;  %s65_s18 = sadd.s32 1, %s498_s11 }
   0x8   : > { %p28_p0 = scmp.ge.s32.totalorder %s27_s17, 2  ;;  %p72_p1 = scmp.ne.s32.totalorder %s498_s11, %s494_s10 }
   0x9   : > { %p73_p2 = scmp.eq.s32.totalorder %s510_s14, 0  ;;  %p78_p3 = scmp.ne.s32.totalorder %s494_s10, %s490_s9 }
   0xa   : > { %s664_s17 = smov (%p28_p0, %s27_s17), 0  ;;  %p79_p5 = scmp.eq.s32.totalorder %s320_s15, 0 }
   0xb   : > { %p569_p4 = por %p73_p2, %p72_p1  ;;  %s61_s20 = ssub.s32 %s506_s13, %s664_s17 }
   0xc   : > { %p104_p6 = scmp.eq.s32.totalorder %s320_s15, 1  ;;  %p63_p7 = scmp.eq.s32.totalorder %s61_s20, 0 }
   0xd   : > { %p575_p8 = por %p79_p5, %p78_p3  ;;  %p110_p10 = scmp.eq.s32.totalorder %s321_s16, 1 }
   0xe   : > { %p579_p9 = por %p104_p6, %p72_p1  ;;  %p324_p12 = scmp.ge.s32.totalorder %s510_s14, 2 }
   0xf   : > { %s584_s23 = scalar_select %p63_p7, %s498_s11, %s65_s18  }
  0x10   : > { %p586_p11 = por %p110_p10, %p78_p3  ;;  %p346_p13 = scmp.lt.s32.totalorder %s510_s14, 2 }
  0x11   : > { %s137_s25 = sand.u32 1, %s498_s11   ;;  %s326_s27 = sshll.u32 %s506_s13, 3 }
  0x12   : > { %s325_s26 = sshll.u32 %s137_s25, 3  ;;  %s147_s30 = scalar_lea.hbm %s652_s1, %s326_s27 }
  0x13   : > { %s141_s3 = scalar_lea.vmem [#allocation2], %s325_s26  ;;  %s149_s5 = sshll.u32 %s147_s30, 4  ;;  %s150_s5 = int_to_ptr.hbm [resolvable:$true] %s149_s5 }
  0x14   : > { %s151_s4 = sshll.u32 %s141_s3, 4  ;;  %p339_p0 = pnand %p346_p13, %p569_p4  ;;  %s152_s4 = int_to_ptr.vmem [resolvable:$true] %s151_s4 }
  0x15   : > { %p327_p1 = scmp.ge.s32.totalorder %s510_s14, 1  ;;  %p156_p2 = scmp.lt.s32.totalorder %s510_s14, 3 }
  0x16   : > { %s138_s6 = scalar_lea.sflag [#allocation3], %s137_s25 }
  0x17   : > { %341 = dma.hbm_to_vmem [thread:$0]  (!%p339_p0), %s150_s5, 128, %s152_s4, %s138_s6  }
  0x18   : > { %p157_p3 = pnand %p327_p1, %p156_p2 }
  0x19   : > { %s602_s7 = sand.u32 (!%p157_p3), 1, %s494_s10  }
  0x1a   : > { %160 = sbr.rel (%p157_p3) target bundleno = 154 (0x9a), region = 28  ;;  %s328_s8 = sshll.u32 (!%p157_p3), %s602_s7, 3 }
  0x1b   : > { %s163_s15 = scalar_lea.sflag (!%p157_p3), [#allocation3], %s602_s7  ;;  %s166_s16 = scalar_lea.vmem (!%p157_p3), [#allocation2], %s328_s8 }
  0x1f   : > { %481 = dma.done.wait (%p575_p8), %s163_s15, 128  }
  0x20   : > { %483 = vsyncadd (%p575_p8), %s163_s15, 4294967168  ;;  %v512_v0 = vmov 0   ;;  %v197_v1 = vld [vmem:[%s651_s0] sm:$0xff]  ;;  %s331_s20 = sshll.u32 %s502_s12, 3  ;;  %s191_s28 = scalar_lea.vmem [#allocation5], %s328_s8 }
  0x21   : > { %397 = vset.pattern.permute.xlu0 %v512_v0  ;;  %s218_s27 = scalar_lea.hbm %s653_s2, %s331_s20  ;;  %v196_v2 = vld [vmem:[%s166_s16] sm:$0xff]  ;;  %s220_s29 = sshll.u32 %s191_s28, 4  ;;  %s221_s29 = int_to_ptr.vmem [resolvable:$true] %s220_s29 }
  0x22   : > { %200 = vperm.xlu0 %397, %v197_v1   ;;  %s222_s21 = sshll.u32 %s218_s27, 4  ;;  %s206_s30 = scalar_lea.sflag [#allocation4], %s602_s7  ;;  %s223_s21 = int_to_ptr.hbm [resolvable:$true] %s222_s21 }
  0x23   : > { %s442_s3 = sshra.s32 %s223_s21, 4  ;;  %s448_s6 = scalar_lea.hbm %s653_s2, 16  ;;  %s443_s3 = int_to_ptr.hbm [resolvable:$true] %s442_s3 }
  0x24   : > { %s444_s4 = scalar_lea.hbm %s443_s3, 8  ;;  %p449_p7 = scmp.lt.s32.totalorder %s443_s3, %s653_s2 }
  0x25   : > { %p445_p4 = scmp.ne.s32.totalorder %s443_s3, %s444_s4  ;;  %p450_p8 = scmp.lt.s32.totalorder %s448_s6, %s444_s4 }
  0x27   : > { %p446_p5 = pnand %p445_p4, %p579_p9  ;;  %p451_p10 = por %p450_p8, %p449_p7 }
  0x29   : > { %p447_p6 = pneg %p446_p5 }
  0x2b   : > { %p452_p13 = pnand %p451_p10, %p447_p6 }
  0x94   : > { %v201_v3 = vpop.permute.xlu0 %200 }
  0x95   : > { %v203_v4 = vmul.f32 %v201_v3, %v196_v2 }
  0x97   : > { %204 = vst [vmem:[%s191_s28] sm:$0xff] %v203_v4 }
  0x98   : > { %455 = shalt.err (!%p452_p13)
}
  0x99   : > { %336 = dma.vmem_to_hbm [thread:$0]  (%p579_p9), %s221_s29, 128, %s223_s21, %s206_s30  }
  0x9a PF: > { %s234_s7 = sand.u32 1, %s490_s9   ;;  %p343_p0 = pnand %p324_p12, %p586_p11 }
  0x9b   : > { %s235_s16 = scalar_lea.sflag [#allocation4], %s234_s7 }
  0x9c   : > { %p344_p1 = pneg %p343_p0 }
  0x9e   : > { %485 = dma.done.wait (%p344_p1), %s235_s16, 128  }
  0x9f   : > { %487 = vsyncadd (%p344_p1), %s235_s16, 4294967168  ;;  %s18_s14 = sadd.s32 1, %s510_s14   ;;  %s658_s9 = smov %s494_s10 }
  0xa0   : > { %p15_p2 = scmp.ge.s32.totalorder %s18_s14, 4   ;;  %s659_s10 = smov %s498_s11 }
  0xa1   : > { %s660_s11 = smov %s584_s23  ;;  %s661_s12 = smov %s506_s13 }
  0xa2   : > { %s662_s13 = smov %s664_s17  ;;  %17 = sbr.rel (!%p15_p2) target bundleno = 6 (0x6), region = 76 }
  0xa7   :  { %241 = vsyncpa [#allocation3], 1 }
  0xa8   :  { %243 = vsyncpa [#allocation3 + $0x1], 1 }
  0xa9   :  { %244 = vsyncpa [#allocation4], 1 }
  0xaa   :  { %246 = vsyncpa [#allocation4 + $0x1], 1 }

</bundles_post_ra>
